<compile_context>
chip_gen: v6e
topology: v6e:2x2x1
jax: 0.10.0
libtpu: 0.0.40
codegen_flags: <defaults>
</compile_context>

<pallas_src>
import jax
import jax.numpy as jnp
from jax import lax
from jax.experimental import pallas as pl
from jax.experimental.pallas import tpu as pltpu

EPS = 1e-4                       # matches l2normalize(v, eps=0.0001)
_VMEM_LIMIT = 32 * 1024 * 1024   # safe on v5e/v6e (128 MiB phys) and v7x (64 MiB phys)


def _round_up(x, m):
    return ((x + m - 1) // m) * m


def _pick_tile(dim, cap, unit):
    """Largest multiple of `unit` that divides `dim` and is <= cap (dim % unit == 0)."""
    cap = max(unit, min(cap, dim))
    best = unit
    for t in range(unit, cap + 1, unit):
        if dim % t == 0:
            best = t
    return best


def _pad2(a, rows, cols):
    """Zero-pad a 2D array up to (rows, cols); no-op (no extra HBM pass) if aligned."""
    pr, pc = rows - a.shape[0], cols - a.shape[1]
    if pr == 0 and pc == 0:
        return a
    return jnp.pad(a, ((0, pr), (0, pc)))


# ---------------------------------------------------------------------------
# Prologue A (W fits VMEM): single pass, whole W resident, one HBM read of W.
# u is carried as an (8, OUTp) slab with only row 0 nonzero so every matmul has a
# layout-friendly >=8 sublane extent; the zero rows do not change any reduction.
# ---------------------------------------------------------------------------
def _sigma_scale_fused_kernel(mult_ref, u_ref, w_ref, scale_ref):
    w = w_ref[...]                                            # (OUTp, INp) bf16
    u = u_ref[...].astype(jnp.bfloat16)                       # (8, OUTp)
    vt = jnp.dot(u, w, preferred_element_type=jnp.float32)    # (8, INp)  f32
    v = (vt / (jnp.sqrt(jnp.sum(vt * vt)) + EPS)).astype(jnp.bfloat16)
    # u~ = v @ W^T   (contract IN; W stays in its native (OUT, IN) layout)
    ut = lax.dot_general(v, w,
                         dimension_numbers=(((1,), (1,)), ((), ())),
                         preferred_element_type=jnp.float32)  # (8, OUTp) f32
    ssq = jnp.sum(ut * ut, keepdims=True)                     # (1, 1) = ||u~||^2
    sigma = ssq / (jnp.sqrt(ssq) + EPS)                       # l2normalize(u~) . u~
    scale_ref[...] = mult_ref[0] / sigma


# ---------------------------------------------------------------------------
# Prologue B (fallback, large W): two-phase, OUT-tiled, bf16 W streamed twice.
#   phase 0: accumulate v~ = W^T u   over OUT row-blocks
#   phase 1: normalize v once, accumulate ||W v||^2 per row-block, finalize scale
# Must stay serial ("arbitrary","arbitrary") because of the VMEM accumulators.
# ---------------------------------------------------------------------------
def _sigma_scale_tiled_kernel(mult_ref, u_ref, w_ref, scale_ref, v_ref, ss_ref):
    phase = pl.program_id(0)
    i = pl.program_id(1)
    nblk = pl.num_programs(1)

    @pl.when((phase == 0) & (i == 0))
    def _init():
        v_ref[...] = jnp.zeros_like(v_ref)
        ss_ref[...] = jnp.zeros_like(ss_ref)

    @pl.when(phase == 0)
    def _accum_v():
        # v~ += u_block @ W_block                                  -> (8, INp)
        v_ref[...] += jnp.dot(u_ref[...].astype(jnp.bfloat16), w_ref[...],
                              preferred_element_type=jnp.float32)

    @pl.when((phase == 1) & (i == 0))
    def _normalize_v():
        vt = v_ref[...]
        v_ref[...] = vt / (jnp.sqrt(jnp.sum(vt * vt)) + EPS)

    @pl.when(phase == 1)
    def _accum_ss():
        # u~_block = v @ W_block^T  (contract IN, no transpose)    -> (8, TN)
        ut = lax.dot_general(v_ref[...].astype(jnp.bfloat16), w_ref[...],
                             dimension_numbers=(((1,), (1,)), ((), ())),
                             preferred_element_type=jnp.float32)
        ss_ref[...] += jnp.sum(ut * ut, keepdims=True)

    @pl.when((phase == 1) & (i == nblk - 1))
    def _finalize():
        ssq = ss_ref[...]                            # ||u~||^2            (1, 1)
        sigma = ssq / (jnp.sqrt(ssq) + EPS)
        scale_ref[...] = mult_ref[0] / sigma


# ---------------------------------------------------------------------------
# Main: y = scale * (x @ W^T) + b.  bf16 tiles, f32 accumulation directly into the
# f32 output block (its block index is constant over k); scale/bias applied once in
# the k==last finalize.  scale comes in through SMEM.
# ---------------------------------------------------------------------------
def _sn_matmul_kernel(scale_ref, x_ref, w_ref, b_ref, y_ref):
    k = pl.program_id(2)

    @pl.when(k == 0)
    def _zero():
        y_ref[...] = jnp.zeros_like(y_ref)

    # x_tile (TM, TK) . W_tile (TN, TK), contracting K; W stays in (OUT, IN) layout.
    y_ref[...] += lax.dot_general(x_ref[...], w_ref[...],
                                  dimension_numbers=(((1,), (1,)), ((), ())),
                                  preferred_element_type=jnp.float32)

    @pl.when(k == pl.num_programs(2) - 1)
    def _finalize():
        y_ref[...] = (scale_ref[0] * y_ref[...] + b_ref[...]).astype(y_ref.dtype)


def spectral_norm_linear(x, w_bar, u, b, multiplier,
                         *, prologue_fused_max_bytes=8 * 1024 * 1024):
    """Fused SpectralNorm(Linear).forward.

    x: (B, IN), w_bar: (OUT, IN) (torch Linear weight layout), u: (OUT,) weight_u,
    b: (OUT,) bias, multiplier: scalar (top singular value at init time).
    """
    B, IN = x.shape
    OUT, IN2 = w_bar.shape
    assert IN2 == IN

    f32, bf16 = jnp.float32, jnp.bfloat16
    Bp = _round_up(B, 8)
    OUTp = _round_up(OUT, 128)
    INp = _round_up(IN, 128)

    # bf16 MXU operands; padding skipped entirely when dims are already aligned.
    xp = _pad2(x.astype(bf16), Bp, INp)
    wp = _pad2(w_bar.astype(bf16), OUTp, INp)
    up = jnp.zeros((8, OUTp), f32).at[0, :OUT].set(u.astype(f32))
    bp = jnp.zeros((1, OUTp), f32).at[0, :OUT].set(b.astype(f32))
    mult = jnp.asarray(multiplier, f32).reshape(1)

    # --- prologue: scale = multiplier / sigma --------------------------------
    w_bytes = OUTp * INp * 2
    if w_bytes <= prologue_fused_max_bytes:
        scale = pl.pallas_call(
            _sigma_scale_fused_kernel,
            out_shape=jax.ShapeDtypeStruct((1, 1), f32),
            grid=(1,),
            in_specs=[
                pl.BlockSpec(memory_space=pltpu.MemorySpace.SMEM),   # multiplier
                pl.BlockSpec((8, OUTp), lambda i: (0, 0)),           # u slab
                pl.BlockSpec((OUTp, INp), lambda i: (0, 0)),         # whole W (bf16)
            ],
            out_specs=pl.BlockSpec((1, 1), lambda i: (0, 0)),
            compiler_params=pltpu.CompilerParams(
                dimension_semantics=("arbitrary",),
                vmem_limit_bytes=_VMEM_LIMIT),
        )(mult, up, wp)
    else:
        TN_PRO = _pick_tile(OUTp, 512, 128)
        scale = pl.pallas_call(
            _sigma_scale_tiled_kernel,
            out_shape=jax.ShapeDtypeStruct((1, 1), f32),
            grid=(2, OUTp // TN_PRO),
            in_specs=[
                pl.BlockSpec(memory_space=pltpu.MemorySpace.SMEM),   # multiplier
                pl.BlockSpec((8, TN_PRO), lambda p, i: (0, i)),      # u block
                pl.BlockSpec((TN_PRO, INp), lambda p, i: (i, 0)),    # W row-block
            ],
            out_specs=pl.BlockSpec((1, 1), lambda p, i: (0, 0)),
            scratch_shapes=[
                pltpu.VMEM((8, INp), f32),   # v accumulator / normalized v
                pltpu.VMEM((1, 1), f32),     # ||u~||^2 accumulator
            ],
            compiler_params=pltpu.CompilerParams(
                dimension_semantics=("arbitrary", "arbitrary"),
                vmem_limit_bytes=_VMEM_LIMIT),
        )(mult, up, wp)

    scale = scale.reshape(1)

    # --- main tiled matmul: y = scale * (x @ W^T) + b ------------------------
    TM = _pick_tile(Bp, 512, 8)
    TN = _pick_tile(OUTp, 512, 128)
    TK = _pick_tile(INp, 1024, 128)
    # v7x megacore: guarantee >=2 parallel blocks when OUT allows it.
    if (Bp // TM) * (OUTp // TN) < 2 and OUTp >= 256:
        TN = _pick_tile(OUTp, OUTp // 2, 128)

    y = pl.pallas_call(
        _sn_matmul_kernel,
        out_shape=jax.ShapeDtypeStruct((Bp, OUTp), f32),
        grid=(Bp // TM, OUTp // TN, INp // TK),
        in_specs=[
            pl.BlockSpec(memory_space=pltpu.MemorySpace.SMEM),     # scale (scalar)
            pl.BlockSpec((TM, TK), lambda i, j, k: (i, k)),        # x tile  (bf16)
            pl.BlockSpec((TN, TK), lambda i, j, k: (j, k)),        # W tile  (bf16, native layout)
            pl.BlockSpec((1, TN), lambda i, j, k: (0, j)),         # bias tile
        ],
        out_specs=pl.BlockSpec((TM, TN), lambda i, j, k: (i, j)),
        compiler_params=pltpu.CompilerParams(
            dimension_semantics=("parallel", "parallel", "arbitrary"),
            vmem_limit_bytes=_VMEM_LIMIT),
    )(scale, xp, wp, bp)

    return y[:B, :OUT]


# ---------------------------------------------------------------------------
# Pure-JAX reference mirroring SpectralNorm._update_u_v + Linear.forward (f32)
# ---------------------------------------------------------------------------
def _l2normalize(v, eps=EPS):
    return v / (jnp.linalg.norm(v) + eps)


def _reference(x, w_bar, u, b, multiplier):
    h = w_bar.shape[0]
    _w = w_bar.reshape(h, -1)
    v = _l2normalize(_w.T @ u)
    u_new = _l2normalize(_w @ v)
    sigma = jnp.dot(u_new, _w @ v)
    w_sn = multiplier * w_bar / sigma
    return x @ w_sn.T + b


def _run_case(key, B, IN, OUT, tol, **kwargs):
    k_x, k_w, k_u, k_b = jax.random.split(key, 4)
    x = jax.random.normal(k_x, (B, IN), dtype=jnp.float32)
    w_bar = jax.random.normal(k_w, (OUT, IN), dtype=jnp.float32) * 0.1
    u = _l2normalize(jax.random.normal(k_u, (OUT,), dtype=jnp.float32))
    b = jax.random.normal(k_b, (OUT,), dtype=jnp.float32) * 0.01
    multiplier = jnp.float32(2.5)   # stands in for the init-time top singular value

    y = jax.block_until_ready(spectral_norm_linear(x, w_bar, u, b, multiplier, **kwargs))
    y_ref = _reference(x, w_bar, u, b, multiplier)
    assert y.shape == y_ref.shape
    rel_err = jnp.max(jnp.abs(y - y_ref)) / (jnp.max(jnp.abs(y_ref)) + 1e-6)
    assert rel_err < tol, (
        f"mismatch (B={B}, IN={IN}, OUT={OUT}): rel err {rel_err}")


if __name__ == "__main__":
    key = jax.random.PRNGKey(0)
    k1, k2, k3 = jax.random.split(key, 3)

    # Small shape consistent with the wrapped Linear module.
    _run_case(k1, B=8, IN=32, OUT=16, tol=2e-2)
    # Multi-tile case exercising the (N, K) accumulation grid + fused sigma prologue.
    _run_case(k2, B=24, IN=1280, OUT=384, tol=2e-2)
    # Same case, forcing the OUT-tiled two-phase prologue fallback path.
    _run_case(k3, B=24, IN=1280, OUT=384, tol=2e-2, prologue_fused_max_bytes=0)

    print("KERNEL_OK")
</pallas_src>

<mosaic_0001>
module attributes {stable_mosaic.version = 11 : i64} {
  func.func @_sigma_scale_fused_kernel(%arg0: i32, %arg1: memref<1xf32, #tpu.memory_space<smem>>, %arg2: memref<8x128xf32, #tpu.memory_space<vmem>>, %arg3: memref<128x128xbf16, #tpu.memory_space<vmem>>, %arg4: memref<1x1xf32, #tpu.memory_space<vmem>>) attributes {dimension_semantics = [#tpu.dimension_semantics<arbitrary>], iteration_bounds = array<i64: 1>, scalar_prefetch = 0 : i64, scratch_operands = 0 : i64, tpu.core_type = #tpu.core_type<tc>, window_params = [{transform_indices = @transform_0, window_bounds = array<i64: 1>}, {pipeline_mode = #tpu.pipeline_mode<synchronous>, transform_indices = @transform_1, window_bounds = array<i64: 8, 128>}, {pipeline_mode = #tpu.pipeline_mode<synchronous>, transform_indices = @transform_2, window_bounds = array<i64: 128, 128>}, {pipeline_mode = #tpu.pipeline_mode<synchronous>, transform_indices = @transform_3, window_bounds = array<i64: 1, 1>}]} {
    %c0 = arith.constant 0 : index
    %c0_0 = arith.constant 0 : index
    %0 = vector.load %arg3[%c0, %c0_0] : memref<128x128xbf16, #tpu.memory_space<vmem>>, vector<128x128xbf16>
    %c0_1 = arith.constant 0 : index
    %c0_2 = arith.constant 0 : index
    %1 = vector.load %arg2[%c0_1, %c0_2] : memref<8x128xf32, #tpu.memory_space<vmem>>, vector<8x128xf32>
    %2 = arith.truncf %1 : vector<8x128xf32> to vector<8x128xbf16>
    %cst = arith.constant dense<0.000000e+00> : vector<8x128xf32>
    %3 = tpu.matmul %2, %0, %cst {dimension_numbers = #tpu.dot_dimension_numbers<[1], [0], [0], [1], [0, 0, 1, 1], [], []>} : vector<8x128xbf16>, vector<128x128xbf16>, vector<8x128xf32> -> vector<8x128xf32>
    %4 = arith.mulf %3, %3 : vector<8x128xf32>
    %5 = vector.shape_cast %4 : vector<8x128xf32> to vector<1x8x128xf32>
    %cst_3 = arith.constant dense<0.000000e+00> : vector<1xf32>
    %6 = vector.multi_reduction <add>, %5, %cst_3 [1, 2] : vector<1x8x128xf32> to vector<1xf32>
    %7 = vector.shape_cast %6 : vector<1xf32> to vector<1x1x1xf32>
    %8 = vector.extract %7[0, 0, 0] : f32 from vector<1x1x1xf32>
    %9 = math.sqrt %8 : f32
    %cst_4 = arith.constant 9.99999974E-5 : f32
    %10 = arith.addf %9, %cst_4 : f32
    %11 = vector.broadcast %10 : f32 to vector<8x128xf32>
    %12 = arith.divf %3, %11 : vector<8x128xf32>
    %13 = arith.truncf %12 : vector<8x128xf32> to vector<8x128xbf16>
    %cst_5 = arith.constant dense<0.000000e+00> : vector<8x128xf32>
    %14 = tpu.matmul %13, %0, %cst_5 {dimension_numbers = #tpu.dot_dimension_numbers<[1], [1], [0], [0], [0, 0, 1, 0], [], []>} : vector<8x128xbf16>, vector<128x128xbf16>, vector<8x128xf32> -> vector<8x128xf32>
    %15 = arith.mulf %14, %14 : vector<8x128xf32>
    %16 = vector.shape_cast %15 : vector<8x128xf32> to vector<1x8x128xf32>
    %cst_6 = arith.constant dense<0.000000e+00> : vector<1xf32>
    %17 = vector.multi_reduction <add>, %16, %cst_6 [1, 2] : vector<1x8x128xf32> to vector<1xf32>
    %18 = vector.shape_cast %17 : vector<1xf32> to vector<1x1x1xf32>
    %19 = vector.extract %18[0, 0, 0] : f32 from vector<1x1x1xf32>
    %20 = vector.broadcast %19 : f32 to vector<1x1xf32>
    %21 = math.sqrt %20 : vector<1x1xf32>
    %cst_7 = arith.constant 9.99999974E-5 : f32
    %22 = vector.broadcast %cst_7 : f32 to vector<1x1xf32>
    %23 = arith.addf %21, %22 : vector<1x1xf32>
    %24 = arith.divf %20, %23 : vector<1x1xf32>
    %c0_8 = arith.constant 0 : index
    %25 = memref.load %arg1[%c0_8] : memref<1xf32, #tpu.memory_space<smem>>
    %26 = vector.broadcast %25 : f32 to vector<1x1xf32>
    %27 = arith.divf %26, %24 : vector<1x1xf32>
    %c0_9 = arith.constant 0 : index
    %c0_10 = arith.constant 0 : index
    %28 = vector.load %arg4[%c0_9, %c0_10] : memref<1x1xf32, #tpu.memory_space<vmem>>, vector<1x1xf32>
    tpu.vector_store %arg4[%c0_9, %c0_10], %27 {strides = array<i32>} : memref<1x1xf32, #tpu.memory_space<vmem>>, vector<1x1xf32>,
    return
  }
  func.func @transform_0(%arg0: i32) -> i32 {
    %c0_i32 = arith.constant 0 : i32
    %c0_i32_0 = arith.constant 0 : i32
    return %c0_i32 : i32
  }
  func.func @transform_1(%arg0: i32) -> (i32, i32) {
    %c0_i32 = arith.constant 0 : i32
    %c0_i32_0 = arith.constant 0 : i32
    %c0_i32_1 = arith.constant 0 : i32
    return %c0_i32, %c0_i32_0 : i32, i32
  }
  func.func @transform_2(%arg0: i32) -> (i32, i32) {
    %c0_i32 = arith.constant 0 : i32
    %c0_i32_0 = arith.constant 0 : i32
    %c0_i32_1 = arith.constant 0 : i32
    return %c0_i32, %c0_i32_0 : i32, i32
  }
  func.func @transform_3(%arg0: i32) -> (i32, i32) {
    %c0_i32 = arith.constant 0 : i32
    %c0_i32_0 = arith.constant 0 : i32
    %c0_i32_1 = arith.constant 0 : i32
    return %c0_i32, %c0_i32_0 : i32, i32
  }
}

</mosaic_0001>

<bundles_post_ra>
// kernel: tpu_custom_call.1
= control target key start
LH: loop header
LB: loop body
LE: loop exit
PB: predicated region body
PF: predicated region fallthrough
CT: control target
= control target key end

     0   :  { %9 = vsyncpa [#allocation4], 0  ;;  %s458_s0 = inlined_call_operand.<no memory space> [shape: f32[1], index: 0, kind: input, shape index: {}]   ;;  %s459_s1 = inlined_call_operand.hbm [shape: f32[8,128], index: 1, kind: input, shape index: {}]   ;;  %s460_s2 = inlined_call_operand.hbm [shape: bf16[128,128], index: 2, kind: input, shape index: {}]   ;;  %s461_s3 = inlined_call_operand.hbm [shape: f32[1,1], index: 3, kind: output, shape index: {}]  }
   0x1   :  { %10 = vsyncpa [#allocation7], 0 }
   0x2   :  { %11 = vsyncpa [#allocation5], 0  ;;  %s419_s12 = smov [#allocation3]   ;;  %s420_s14 = smov [#allocation6]  }
   0x3   :  { %s20_s13 = sshll.u32 %s419_s12, 4  ;;  %s29_s15 = sshll.u32 %s420_s14, 4  ;;  %s21_s13 = int_to_ptr.vmem [resolvable:$true] %s20_s13  ;;  %s30_s15 = int_to_ptr.vmem [resolvable:$true] %s29_s15 }
   0x4   :  { %s361_s16 = scalar_lea.vmem %s21_s13, 128  ;;  %p366_p1 = scmp.lt.s32.totalorder %s21_s13, %s21_s13 }
   0x5   :  { %p362_p0 = scmp.ne.s32.totalorder %s21_s13, %s361_s16  ;;  %p367_p2 = scmp.lt.s32.totalorder %s361_s16, %s361_s16 }
   0x7   :  { %p368_p3 = por %p367_p2, %p366_p1 }
   0x9   :  { %p369_p4 = pnand %p368_p3, %p362_p0 }
   0xb   :  { %372 = shalt.err (!%p369_p4)
}
   0xc   :  { %23 = dma.hbm_to_vmem [thread:$0]  %s459_s1, 128, %s21_s13, [#allocation4]  }
   0xd   :  { %s381_s19 = scalar_lea.vmem %s30_s15, 1024  ;;  %p386_p6 = scmp.lt.s32.totalorder %s30_s15, %s30_s15 }
   0xe   :  { %p382_p5 = scmp.ne.s32.totalorder %s30_s15, %s381_s19  ;;  %p387_p7 = scmp.lt.s32.totalorder %s381_s19, %s381_s19 }
  0x10   :  { %p388_p8 = por %p387_p7, %p386_p6 }
  0x12   :  { %p389_p9 = pnand %p388_p8, %p382_p5 }
  0x14   :  { %392 = shalt.err (!%p389_p9)
}
  0x15   :  { %s421_s20 = smov 64   ;;  %s422_s21 = smov 4  }
  0x16   :  { %35 = dma.hbm_to_vmem [thread:$0]  %s460_s2, 1024, %s30_s15, [#allocation7], %s421_s20, %s421_s20, %s422_s21  }
  0x17   :  { %413 = dma.done.wait [#allocation4], 128  }
  0x18   :  { %414 = vsyncadd [#allocation4], 4294967168 }
  0x19   :  { %415 = dma.done.wait [#allocation7], 1024  }
  0x1a   :  { %416 = vsyncadd [#allocation7], 4294966272  ;;  %v423_v0 = vmov 0.0   ;;  %vm424_vm0 = vmmov 0   ;;  %v335_v1 = vld [vmem:[#allocation6 + $0x38] sm:$0xff]   ;;  %v336_v2 = vld [vmem:[#allocation6 + $0x30] sm:$0xff]   ;;  %v235_v54 = vstv %s458_s0 }
  0x1b   :  { %282 = vmatprep.subr.bf16.mxu0 %v423_v0  ;;  %298 = vmatprep.mubr.msk.bf16.mxu0 %vm424_vm0, %v423_v0  ;;  %v337_v3 = vld [vmem:[#allocation6 + $0x28] sm:$0xff]   ;;  %v338_v4 = vld [vmem:[#allocation6 + $0x20] sm:$0xff]   ;;  %v339_v5 = vld [vmem:[#allocation6 + $0x18] sm:$0xff]   ;;  %s425_s28 = smov [#allocation8]   ;;  %vm238_vm5 = vcmask 0  }
  0x1c   :  { %302 = vmatprep.subr.bf16.mxu1 %v423_v0  ;;  %318 = vmatprep.mubr.msk.bf16.mxu1 %vm424_vm0, %v423_v0  ;;  %v340_v6 = vld [vmem:[#allocation6 + $0x10] sm:$0xff]   ;;  %v341_v7 = vld [vmem:[#allocation6 + $0x8] sm:$0xff]   ;;  %v342_v8 = vld [vmem:[#allocation6] sm:$0xff]   ;;  %s246_s29 = sshll.u32 %s425_s28, 4  ;;  %s247_s29 = int_to_ptr.vmem [resolvable:$true] %s246_s29 }
  0x1d   :  { %283 = vmatpush3.bf16.msra.mxu0 %v335_v1  ;;  %303 = vmatpush3.bf16.xpose.msra.mxu1 %v335_v1  ;;  %v59_v9 = vld [vmem:[#allocation3] sm:$0xff]  ;;  %s393_s30 = scalar_lea.vmem %s247_s29, 16  ;;  %s397_s4 = scalar_lea.vmem %s247_s29, 32 }
  0x1e   :  { %284 = vmatprep.subr.bf16.mxu0 %v423_v0  ;;  %304 = vmatprep.subr.bf16.mxu1 %v423_v0  ;;  %v60_v10 = vpack.c.bf16 %v59_v9, %v59_v9  ;;  %p394_p10 = scmp.ne.s32.totalorder %s247_s29, %s393_s30  ;;  %p398_p11 = scmp.lt.s32.totalorder %s247_s29, %s247_s29 }
  0x1f   :  { %p399_p12 = scmp.lt.s32.totalorder %s397_s4, %s393_s30 }
  0x21   :  { %285 = vmatpush3.bf16.msra.mxu0 %v336_v2  ;;  %p400_p13 = por %p399_p12, %p398_p11 }
  0x22   :  { %286 = vmatprep.subr.bf16.mxu0 %v423_v0 }
  0x23   :  { %p401_p0 = pnand %p400_p13, %p394_p10 }
  0x25   :  { %287 = vmatpush3.bf16.msra.mxu0 %v337_v3  ;;  %305 = vmatpush3.bf16.xpose.msra.mxu1 %v336_v2 }
  0x26   :  { %288 = vmatprep.subr.bf16.mxu0 %v423_v0  ;;  %306 = vmatprep.subr.bf16.mxu1 %v423_v0 }
  0x29   :  { %289 = vmatpush3.bf16.msra.mxu0 %v338_v4 }
  0x2a   :  { %290 = vmatprep.subr.bf16.mxu0 %v423_v0 }
  0x2d   :  { %291 = vmatpush3.bf16.msra.mxu0 %v339_v5  ;;  %307 = vmatpush3.bf16.xpose.msra.mxu1 %v337_v3 }
  0x2e   :  { %292 = vmatprep.subr.bf16.mxu0 %v423_v0  ;;  %308 = vmatprep.subr.bf16.mxu1 %v423_v0 }
  0x31   :  { %293 = vmatpush3.bf16.msra.mxu0 %v340_v6 }
  0x32   :  { %294 = vmatprep.subr.bf16.mxu0 %v423_v0 }
  0x35   :  { %295 = vmatpush3.bf16.msra.mxu0 %v341_v7  ;;  %309 = vmatpush3.bf16.xpose.msra.mxu1 %v338_v4 }
  0x36   :  { %296 = vmatprep.subr.bf16.mxu0 %v423_v0  ;;  %310 = vmatprep.subr.bf16.mxu1 %v423_v0 }
  0x39   :  { %297 = vmatpush3.bf16.msra.mxu0 %v342_v8 }
  0x3c   :  { %299 = vmatmul.mubr.bf16.vlgmr.msra.gmra.mxu0 %v60_v10 }
  0x3d   :  { %311 = vmatpush3.bf16.xpose.msra.mxu1 %v339_v5 }
  0x3e   :  { %312 = vmatprep.subr.bf16.mxu1 %v423_v0 }
  0x45   :  { %313 = vmatpush3.bf16.xpose.msra.mxu1 %v340_v6 }
  0x46   :  { %314 = vmatprep.subr.bf16.mxu1 %v423_v0 }
  0x4d   :  { %315 = vmatpush3.bf16.xpose.msra.mxu1 %v341_v7 }
  0x4e   :  { %316 = vmatprep.subr.bf16.mxu1 %v423_v0 }
  0x55   :  { %317 = vmatpush3.bf16.xpose.msra.mxu1 %v342_v8 }
  0xfc   :  { %v143_v11 = vpop.f32.mrf.mxu0 }
  0xfd   :  { %v149_v12 = vmul.f32 %v143_v11, %v143_v11 }
  0xfe   :  { %v300_v13 = vpop.f32.mrf.mxu0 }
  0xff   :  { %150 = vadd.xlane.f32.xlu0 %v149_v12 }
 0x100   :  { %v146_v14 = vpop.f32.mrf.mxu0 }
 0x102   :  { %v301_v15 = vpop.f32.mrf.mxu0 }
 0x188   :  { %v151_v16 = vpop.xlane.xlu0 %150 }
 0x189   :  { %v152_v17 = vrot.slane %v151_v16, 4 }
 0x18b   :  { %v153_v18 = vadd.f32 %v152_v17, %v151_v16 }
 0x18d   :  { %v154_v19 = vrot.slane %v153_v18, 2 }
 0x18f   :  { %v155_v20 = vadd.f32 %v154_v19, %v153_v18 }
 0x191   :  { %v156_v21 = vrot.slane %v155_v20, 1 }
 0x193   :  { %v157_v22 = vadd.f32 %v156_v21, %v155_v20 }
 0x195   :  { %322 = vpush %v157_v22 }
 0x1c6   :  { %s323_s1 = spop %322 }
 0x1c7   :  { %v159_v23 = vstv %s323_s1 }
 0x1c8   :  { %343 = vrsqrt.f32 %v159_v23  ;;  %vm162_vm1 = vcmp.eq.f32.partialorder %v159_v23, inf  ;;  %v165_v26 = vand.u32 2147483648, %v159_v23  ;;  %vm164_vm2 = vcmp.eq.f32.partialorder %v159_v23, 0.0 }
 0x1d5   :  { %v344_v24 = vpop.eup %343 }
 0x1d6   :  { %v161_v25 = vmul.f32 %v344_v24, %v159_v23 }
 0x1d8   :  { %v163_v27 = vsel %vm162_vm1, %v159_v23, %v161_v25 }
 0x1d9   :  { %v166_v28 = vsel %vm164_vm2, %v165_v26, %v163_v27 }
 0x1da   :  { %324 = vpush %v166_v28 }
 0x20b   :  { %s325_s2 = spop %324 }
 0x20c   :  { %s168_s24 = sadd.f32 0.0001, %s325_s2 }
 0x20e   :  { %v169_v29 = vstv %s168_s24 }
 0x20f   :  { %345 = vrcp.f32 %v169_v29 }
 0x21c   :  { %v346_v30 = vpop.eup %345 }
 0x21d   :  { %v171_v31 = vmul.f32 %v346_v30, %v143_v11 }
 0x21f   :  { %v172_v32 = vpack.c.bf16 %v171_v31, %v171_v31 }
 0x221   :  { %319 = vmatmul.mubr.bf16.vlgmr.msra.gmra.mxu1 %v172_v32 }
 0x2e1   :  { %v207_v33 = vpop.f32.mrf.mxu1 }
 0x2e2   :  { %v213_v34 = vmul.f32 %v207_v33, %v207_v33 }
 0x2e3   :  { %v320_v35 = vpop.f32.mrf.mxu1 }
 0x2e4   :  { %214 = vadd.xlane.f32.xlu0 %v213_v34 }
 0x2e5   :  { %v210_v36 = vpop.f32.mrf.mxu1 }
 0x2e7   :  { %v321_v37 = vpop.f32.mrf.mxu1 }
 0x36d   :  { %v215_v38 = vpop.xlane.xlu0 %214 }
 0x36e   :  { %v216_v39 = vrot.slane %v215_v38, 4 }
 0x370   :  { %v217_v40 = vadd.f32 %v216_v39, %v215_v38 }
 0x372   :  { %v218_v41 = vrot.slane %v217_v40, 2 }
 0x374   :  { %v219_v42 = vadd.f32 %v218_v41, %v217_v40 }
 0x376   :  { %v220_v43 = vrot.slane %v219_v42, 1 }
 0x378   :  { %v221_v44 = vadd.f32 %v220_v43, %v219_v42 }
 0x37a   :  { %326 = vpush %v221_v44 }
 0x3ab   :  { %s327_s25 = spop %326 }
 0x3ac   :  { %v223_v45 = vstv %s327_s25 }
 0x3ad   :  { %347 = vrsqrt.f32 %v223_v45  ;;  %vm226_vm3 = vcmp.eq.f32.partialorder %v223_v45, inf  ;;  %v229_v48 = vand.u32 2147483648, %v223_v45  ;;  %vm228_vm4 = vcmp.eq.f32.partialorder %v223_v45, 0.0 }
 0x3ba   :  { %v348_v46 = vpop.eup %347 }
 0x3bb   :  { %v225_v47 = vmul.f32 %v348_v46, %v223_v45 }
 0x3bd   :  { %v227_v49 = vsel %vm226_vm3, %v223_v45, %v225_v47 }
 0x3be   :  { %v230_v50 = vsel %vm228_vm4, %v229_v48, %v227_v49 }
 0x3bf   :  { %v231_v51 = vadd.f32 0.0001, %v230_v50 }
 0x3c1   :  { %349 = vrcp.f32 %v231_v51 }
 0x3ce   :  { %v350_v52 = vpop.eup %349 }
 0x3cf   :  { %v233_v53 = vmul.f32 %v350_v52, %v223_v45 }
 0x3d1   :  { %351 = vrcp.f32 %v233_v53 }
 0x3de   :  { %v352_v55 = vpop.eup %351 }
 0x3df   :  { %v237_v56 = vmul.f32 %v352_v55, %v235_v54 }
 0x3e1   :  { %239 = vst.msk [vmem:[#allocation8] sm:$0x1] %vm238_vm5, %v237_v56 }
 0x3e2   :  { %404 = shalt.err (!%p401_p0)
}
 0x3e3   :  { %249 = dma.vmem_to_hbm [thread:$0]  %s247_s29, 16, %s461_s3, [#allocation5]  }
 0x3e4   :  { %417 = dma.done.wait [#allocation5], 16  }
 0x3e5   :  { %418 = vsyncadd [#allocation5], 4294967280 }
 0x3e6   :  { %253 = vsyncpa [#allocation4], 1 }
 0x3e7   :  { %254 = vsyncpa [#allocation7], 1 }
 0x3e8   :  { %255 = vsyncpa [#allocation5], 1 }

</bundles_post_ra>
